<compile_context>
chip_gen: v6e
topology: v6e:2x2x1
jax: 0.10.0
libtpu: 0.0.40
codegen_flags: <defaults>
</compile_context>

<pallas_src>
import numpy as np
import jax
import jax.numpy as jnp
from jax.experimental import pallas as pl
from jax.experimental.pallas import tpu as pltpu


# Cast the dominant MXU matmul operands to bf16 (f32 accumulation) per the perf
# review; set False for bit-closer-to-f32 numerics.
USE_BF16_MXU = True


# ----------------------------- Pallas kernels ------------------------------

def down_branch_kernel(d_ref, wc_ref, m_ref, o_ref):
    # d_ref : (1, Cin, Hd*Wd)  low-res "down" feature slab for one batch element
    # wc_ref: (Cout, Cin)      Conv2d(Cin, Cout, 1, bias=False) weight
    # m_ref : (Hd*Wd, H*W)     bilinear (align_corners=True) upsample matrix
    # o_ref : (1, Cout, H*W)
    t = jnp.dot(wc_ref[...], d_ref[0], preferred_element_type=jnp.float32)  # (Cout, HdWd)
    u = jnp.dot(t, m_ref[...], preferred_element_type=jnp.float32)          # (Cout, HW)
    o_ref[0] = jnp.maximum(u, 0.0).astype(o_ref.dtype)                      # relu


def conv_se_kernel(p_ref, wmat_ref, w1_ref, w2_ref, o_ref):
    # p_ref   : (1, K, HW)   im2col patches of merge, K = 3*Cout*9
    # wmat_ref: (Cout, K)    conv_cat (3x3, bias=False) weight reshaped
    # w1_ref  : (Cq, Cout)   fc Linear 1 weight (Cq = Cout // 4)
    # w2_ref  : (Cout, Cq)   fc Linear 2 weight
    # o_ref   : (1, Cout, HW)
    P = p_ref[0]
    Wm = wmat_ref[...]
    if USE_BF16_MXU:
        mc = jnp.dot(Wm.astype(jnp.bfloat16), P.astype(jnp.bfloat16),
                     preferred_element_type=jnp.float32)                    # (Cout, HW)
    else:
        mc = jnp.dot(Wm, P, preferred_element_type=jnp.float32)
    mc = jnp.maximum(mc, 0.0)                                               # relu_cat

    # --- squeeze-excite channel attention, all in f32, all in VMEM ---
    y = jnp.sum(mc, axis=-1, keepdims=True) * (1.0 / mc.shape[-1])          # GAP (Cout, 1)
    h = jnp.maximum(jnp.dot(w1_ref[...], y, preferred_element_type=jnp.float32), 0.0)
    z = jnp.dot(w2_ref[...], h, preferred_element_type=jnp.float32)         # (Cout, 1)
    s = 1.0 / (1.0 + jnp.exp(-z))                                           # sigmoid
    o_ref[0] = (s * mc).astype(o_ref.dtype)                                 # channel rescale


# ----------------------------- wrappers -------------------------------------

def down_branch_pallas(down_flat, w_conv, m):
    """down_flat: (B, Cin, Hd*Wd), w_conv: (Cout, Cin), m: (Hd*Wd, HW) -> (B, Cout, HW)."""
    B, Cin, HdWd = down_flat.shape
    Cout = w_conv.shape[0]
    HW = m.shape[1]
    return pl.pallas_call(
        down_branch_kernel,
        out_shape=jax.ShapeDtypeStruct((B, Cout, HW), down_flat.dtype),
        grid=(B,),
        in_specs=[
            pl.BlockSpec((1, Cin, HdWd), lambda b: (b, 0, 0)),
            pl.BlockSpec((Cout, Cin), lambda b: (0, 0)),
            pl.BlockSpec((HdWd, HW), lambda b: (0, 0)),
        ],
        out_specs=pl.BlockSpec((1, Cout, HW), lambda b: (b, 0, 0)),
        compiler_params=pltpu.CompilerParams(dimension_semantics=("parallel",)),
        cost_estimate=pl.CostEstimate(
            flops=2 * B * (Cout * Cin * HdWd + Cout * HdWd * HW),
            transcendentals=0,
            bytes_accessed=4 * (B * Cin * HdWd + B * Cout * HW + Cout * Cin + HdWd * HW),
        ),
    )(down_flat, w_conv, m)


def conv_se_pallas(patches, w_mat, w_fc1, w_fc2):
    """patches: (B, K, HW), w_mat: (Cout, K), w_fc1: (Cq, Cout), w_fc2: (Cout, Cq)."""
    B, K, HW = patches.shape
    Cout = w_mat.shape[0]
    Cq = w_fc1.shape[0]
    return pl.pallas_call(
        conv_se_kernel,
        out_shape=jax.ShapeDtypeStruct((B, Cout, HW), patches.dtype),
        grid=(B,),
        in_specs=[
            pl.BlockSpec((1, K, HW), lambda b: (b, 0, 0)),
            pl.BlockSpec((Cout, K), lambda b: (0, 0)),
            pl.BlockSpec((Cq, Cout), lambda b: (0, 0)),
            pl.BlockSpec((Cout, Cq), lambda b: (0, 0)),
        ],
        out_specs=pl.BlockSpec((1, Cout, HW), lambda b: (b, 0, 0)),
        compiler_params=pltpu.CompilerParams(dimension_semantics=("parallel",)),
        cost_estimate=pl.CostEstimate(
            flops=2 * B * (Cout * K * HW + Cq * Cout + Cout * Cq),
            transcendentals=B * Cout,
            bytes_accessed=4 * (B * K * HW + B * Cout * HW + Cout * K + 2 * Cq * Cout),
        ),
    )(patches, w_mat, w_fc1, w_fc2)


# ----------------------------- glue (constants / data movement) -------------

def _bilinear_matrix(in_size, out_size):
    """1-D bilinear interpolation matrix replicating F.interpolate(align_corners=True)."""
    R = np.zeros((out_size, in_size), dtype=np.float32)
    if out_size == 1:
        R[0, 0] = 1.0
        return R
    scale = (in_size - 1) / (out_size - 1)
    for i in range(out_size):
        src = i * scale
        i0 = min(int(np.floor(src)), in_size - 1)
        i1 = min(i0 + 1, in_size - 1)
        frac = src - i0
        R[i, i0] += 1.0 - frac
        R[i, i1] += frac
    return R


def bilinear_upsample_matrix(hd, wd, h, w):
    """(Hd*Wd, H*W) matrix M with  upsampled_flat = x_flat @ M  (align_corners=True)."""
    Rh = _bilinear_matrix(hd, h)
    Rw = _bilinear_matrix(wd, w)
    return jnp.asarray(np.kron(Rh, Rw).T)


def famca_forward(left, down, right, params):
    """FAMCA forward. left/right: (B, C, H, W), down: (B, Cin, Hd, Wd) -> (B, C, H, W)."""
    B, C, H, W = left.shape
    Cin, Hd, Wd = down.shape[1], down.shape[2], down.shape[3]
    HW = H * W
    # torch uses size=left.size()[2] (an int -> square target); assumes H == W.

    # --- down branch: bilinear upsample + 1x1 conv + relu, one fused Pallas kernel ---
    M = bilinear_upsample_matrix(Hd, Wd, H, W)                       # static constant
    down_flat = down.reshape(B, Cin, Hd * Wd)
    down_up = down_branch_pallas(down_flat, params["w_conv"], M)     # (B, C, HW)
    down_up = down_up.reshape(B, C, H, W)

    # --- merge + im2col for the 3x3/pad=1 conv (pure data movement, XLA glue) ---
    merge = jnp.concatenate([left, down_up, right], axis=1)          # (B, 3C, H, W)
    mp = jnp.pad(merge, ((0, 0), (0, 0), (1, 1), (1, 1)))
    taps = [mp[:, :, dy:dy + H, dx:dx + W] for dy in range(3) for dx in range(3)]
    patches = jnp.stack(taps, axis=2).reshape(B, 3 * C * 9, HW)      # k = c*9 + dy*3 + dx

    # --- fused 3x3-conv + relu + GAP + fc + sigmoid + channel rescale ---
    w_mat = params["w_cat"].reshape(C, 3 * C * 9)                    # matches patch layout
    out_flat = conv_se_pallas(patches, w_mat, params["w_fc1"], params["w_fc2"])
    return out_flat.reshape(B, C, H, W)


# ----------------------------- main -----------------------------------------

if __name__ == "__main__":
    B, Cin, Cout = 2, 8, 8
    H = W = 16
    Hd = Wd = 8

    key = jax.random.PRNGKey(0)
    k = jax.random.split(key, 8)
    left = jax.random.normal(k[0], (B, Cout, H, W), dtype=jnp.float32)
    down = jax.random.normal(k[1], (B, Cin, Hd, Wd), dtype=jnp.float32)
    right = jax.random.normal(k[2], (B, Cout, H, W), dtype=jnp.float32)

    # deterministic synthetic parameters (shapes follow the module __init__)
    params = {
        "w_conv": 0.1 * jax.random.normal(k[3], (Cout, Cin), jnp.float32),           # conv 1x1
        "w_cat": 0.1 * jax.random.normal(k[4], (Cout, 3 * Cout, 3, 3), jnp.float32), # conv_cat 3x3
        "w_fc1": 0.1 * jax.random.normal(k[5], (Cout // 4, Cout), jnp.float32),      # Linear 1
        "w_fc2": 0.1 * jax.random.normal(k[6], (Cout, Cout // 4), jnp.float32),      # Linear 2
    }

    out = jax.jit(famca_forward)(left, down, right, params)
    jax.block_until_ready(out)
    assert out.shape == (B, Cout, H, W)
    print("KERNEL_OK")
</pallas_src>

<mosaic_0001>
module attributes {stable_mosaic.version = 11 : i64} {
  func.func @down_branch_kernel(%arg0: i32, %arg1: memref<1x8x64xf32, #tpu.memory_space<vmem>>, %arg2: memref<8x8xf32, #tpu.memory_space<vmem>>, %arg3: memref<64x256xf32, #tpu.memory_space<vmem>>, %arg4: memref<1x8x256xf32, #tpu.memory_space<vmem>>) attributes {dimension_semantics = [#tpu.dimension_semantics<parallel>], iteration_bounds = array<i64: 2>, scalar_prefetch = 0 : i64, scratch_operands = 0 : i64, tpu.core_type = #tpu.core_type<tc>, window_params = [{transform_indices = @transform_0, window_bounds = array<i64: 1, 8, 64>}, {pipeline_mode = #tpu.pipeline_mode<synchronous>, transform_indices = @transform_1, window_bounds = array<i64: 8, 8>}, {pipeline_mode = #tpu.pipeline_mode<synchronous>, transform_indices = @transform_2, window_bounds = array<i64: 64, 256>}, {transform_indices = @transform_3, window_bounds = array<i64: 1, 8, 256>}]} {
    %c0 = arith.constant 0 : index
    %c0_0 = arith.constant 0 : index
    %0 = vector.load %arg2[%c0, %c0_0] : memref<8x8xf32, #tpu.memory_space<vmem>>, vector<8x8xf32>
    %c0_1 = arith.constant 0 : index
    %c0_2 = arith.constant 0 : index
    %c0_3 = arith.constant 0 : index
    %1 = vector.load %arg1[%c0_1, %c0_2, %c0_3] : memref<1x8x64xf32, #tpu.memory_space<vmem>>, vector<1x8x64xf32>
    %2 = vector.shape_cast %1 : vector<1x8x64xf32> to vector<8x64xf32>
    %cst = arith.constant dense<0.000000e+00> : vector<8x64xf32>
    %3 = tpu.matmul %0, %2, %cst {dimension_numbers = #tpu.dot_dimension_numbers<[1], [0], [0], [1], [0, 0, 1, 1], [], []>} : vector<8x8xf32>, vector<8x64xf32>, vector<8x64xf32> -> vector<8x64xf32>
    %c0_4 = arith.constant 0 : index
    %c0_5 = arith.constant 0 : index
    %4 = vector.load %arg3[%c0_4, %c0_5] : memref<64x256xf32, #tpu.memory_space<vmem>>, vector<64x256xf32>
    %cst_6 = arith.constant dense<0.000000e+00> : vector<8x256xf32>
    %5 = tpu.matmul %3, %4, %cst_6 {dimension_numbers = #tpu.dot_dimension_numbers<[1], [0], [0], [1], [0, 0, 1, 1], [], []>} : vector<8x64xf32>, vector<64x256xf32>, vector<8x256xf32> -> vector<8x256xf32>
    %cst_7 = arith.constant 0.000000e+00 : f32
    %6 = vector.broadcast %cst_7 : f32 to vector<8x256xf32>
    %7 = arith.maximumf %5, %6 : vector<8x256xf32>
    %c0_8 = arith.constant 0 : index
    %c0_9 = arith.constant 0 : index
    %c0_10 = arith.constant 0 : index
    %8 = vector.load %arg4[%c0_8, %c0_9, %c0_10] : memref<1x8x256xf32, #tpu.memory_space<vmem>>, vector<1x8x256xf32>
    %9 = vector.shape_cast %8 : vector<1x8x256xf32> to vector<8x256xf32>
    %10 = vector.shape_cast %7 : vector<8x256xf32> to vector<1x8x256xf32>
    tpu.vector_store %arg4[%c0_8, %c0_9, %c0_10], %10 {strides = array<i32>} : memref<1x8x256xf32, #tpu.memory_space<vmem>>, vector<1x8x256xf32>,
    return
  }
  func.func @transform_0(%arg0: i32) -> (i32, i32, i32) {
    %c0_i32 = arith.constant 0 : i32
    %c0_i32_0 = arith.constant 0 : i32
    %c0_i32_1 = arith.constant 0 : i32
    return %arg0, %c0_i32, %c0_i32_0 : i32, i32, i32
  }
  func.func @transform_1(%arg0: i32) -> (i32, i32) {
    %c0_i32 = arith.constant 0 : i32
    %c0_i32_0 = arith.constant 0 : i32
    %c0_i32_1 = arith.constant 0 : i32
    return %c0_i32, %c0_i32_0 : i32, i32
  }
  func.func @transform_2(%arg0: i32) -> (i32, i32) {
    %c0_i32 = arith.constant 0 : i32
    %c0_i32_0 = arith.constant 0 : i32
    %c0_i32_1 = arith.constant 0 : i32
    return %c0_i32, %c0_i32_0 : i32, i32
  }
  func.func @transform_3(%arg0: i32) -> (i32, i32, i32) {
    %c0_i32 = arith.constant 0 : i32
    %c0_i32_0 = arith.constant 0 : i32
    %c0_i32_1 = arith.constant 0 : i32
    return %arg0, %c0_i32, %c0_i32_0 : i32, i32, i32
  }
}

module attributes {stable_mosaic.version = 11 : i64} {
  func.func @conv_se_kernel(%arg0: i32, %arg1: memref<1x216x256xf32, #tpu.memory_space<vmem>>, %arg2: memref<8x216xf32, #tpu.memory_space<vmem>>, %arg3: memref<2x8xf32, #tpu.memory_space<vmem>>, %arg4: memref<8x2xf32, #tpu.memory_space<vmem>>, %arg5: memref<1x8x256xf32, #tpu.memory_space<vmem>>) attributes {dimension_semantics = [#tpu.dimension_semantics<parallel>], iteration_bounds = array<i64: 2>, scalar_prefetch = 0 : i64, scratch_operands = 0 : i64, tpu.core_type = #tpu.core_type<tc>, window_params = [{transform_indices = @transform_0, window_bounds = array<i64: 1, 216, 256>}, {pipeline_mode = #tpu.pipeline_mode<synchronous>, transform_indices = @transform_1, window_bounds = array<i64: 8, 216>}, {pipeline_mode = #tpu.pipeline_mode<synchronous>, transform_indices = @transform_2, window_bounds = array<i64: 2, 8>}, {pipeline_mode = #tpu.pipeline_mode<synchronous>, transform_indices = @transform_3, window_bounds = array<i64: 8, 2>}, {transform_indices = @transform_4, window_bounds = array<i64: 1, 8, 256>}]} {
    %c0 = arith.constant 0 : index
    %c0_0 = arith.constant 0 : index
    %c0_1 = arith.constant 0 : index
    %0 = vector.load %arg1[%c0, %c0_0, %c0_1] : memref<1x216x256xf32, #tpu.memory_space<vmem>>, vector<1x216x256xf32>
    %1 = vector.shape_cast %0 : vector<1x216x256xf32> to vector<216x256xf32>
    %c0_2 = arith.constant 0 : index
    %c0_3 = arith.constant 0 : index
    %2 = vector.load %arg2[%c0_2, %c0_3] : memref<8x216xf32, #tpu.memory_space<vmem>>, vector<8x216xf32>
    %3 = arith.truncf %2 : vector<8x216xf32> to vector<8x216xbf16>
    %4 = arith.truncf %1 : vector<216x256xf32> to vector<216x256xbf16>
    %cst = arith.constant dense<0.000000e+00> : vector<8x256xf32>
    %5 = tpu.matmul %3, %4, %cst {dimension_numbers = #tpu.dot_dimension_numbers<[1], [0], [0], [1], [0, 0, 1, 1], [], []>} : vector<8x216xbf16>, vector<216x256xbf16>, vector<8x256xf32> -> vector<8x256xf32>
    %cst_4 = arith.constant 0.000000e+00 : f32
    %6 = vector.broadcast %cst_4 : f32 to vector<8x256xf32>
    %7 = arith.maximumf %5, %6 : vector<8x256xf32>
    %cst_5 = arith.constant dense<0.000000e+00> : vector<8xf32>
    %8 = vector.multi_reduction <add>, %7, %cst_5 [1] : vector<8x256xf32> to vector<8xf32>
    %9 = vector.shape_cast %8 : vector<8xf32> to vector<8x1xf32>
    %cst_6 = arith.constant 3.906250e-03 : f32
    %10 = vector.broadcast %cst_6 : f32 to vector<8x1xf32>
    %11 = arith.mulf %9, %10 : vector<8x1xf32>
    %c0_7 = arith.constant 0 : index
    %c0_8 = arith.constant 0 : index
    %12 = vector.load %arg3[%c0_7, %c0_8] : memref<2x8xf32, #tpu.memory_space<vmem>>, vector<2x8xf32>
    %cst_9 = arith.constant dense<0.000000e+00> : vector<2x1xf32>
    %13 = tpu.matmul %12, %11, %cst_9 {dimension_numbers = #tpu.dot_dimension_numbers<[1], [0], [0], [1], [0, 0, 1, 1], [], []>} : vector<2x8xf32>, vector<8x1xf32>, vector<2x1xf32> -> vector<2x1xf32>
    %cst_10 = arith.constant 0.000000e+00 : f32
    %14 = vector.broadcast %cst_10 : f32 to vector<2x1xf32>
    %15 = arith.maximumf %13, %14 : vector<2x1xf32>
    %c0_11 = arith.constant 0 : index
    %c0_12 = arith.constant 0 : index
    %16 = vector.load %arg4[%c0_11, %c0_12] : memref<8x2xf32, #tpu.memory_space<vmem>>, vector<8x2xf32>
    %cst_13 = arith.constant dense<0.000000e+00> : vector<8x1xf32>
    %17 = tpu.matmul %16, %15, %cst_13 {dimension_numbers = #tpu.dot_dimension_numbers<[1], [0], [0], [1], [0, 0, 1, 1], [], []>} : vector<8x2xf32>, vector<2x1xf32>, vector<8x1xf32> -> vector<8x1xf32>
    %cst_14 = arith.constant 0.000000e+00 : f32
    %18 = vector.broadcast %cst_14 : f32 to vector<8x1xf32>
    %19 = arith.subf %18, %17 : vector<8x1xf32>
    %20 = math.exp %19 : vector<8x1xf32>
    %cst_15 = arith.constant 1.000000e+00 : f32
    %21 = vector.broadcast %cst_15 : f32 to vector<8x1xf32>
    %22 = arith.addf %21, %20 : vector<8x1xf32>
    %cst_16 = arith.constant 1.000000e+00 : f32
    %23 = vector.broadcast %cst_16 : f32 to vector<8x1xf32>
    %24 = arith.divf %23, %22 : vector<8x1xf32>
    %25 = vector.broadcast %24 : vector<8x1xf32> to vector<8x256xf32>
    %26 = arith.mulf %25, %7 : vector<8x256xf32>
    %c0_17 = arith.constant 0 : index
    %c0_18 = arith.constant 0 : index
    %c0_19 = arith.constant 0 : index
    %27 = vector.load %arg5[%c0_17, %c0_18, %c0_19] : memref<1x8x256xf32, #tpu.memory_space<vmem>>, vector<1x8x256xf32>
    %28 = vector.shape_cast %27 : vector<1x8x256xf32> to vector<8x256xf32>
    %29 = vector.shape_cast %26 : vector<8x256xf32> to vector<1x8x256xf32>
    tpu.vector_store %arg5[%c0_17, %c0_18, %c0_19], %29 {strides = array<i32>} : memref<1x8x256xf32, #tpu.memory_space<vmem>>, vector<1x8x256xf32>,
    return
  }
  func.func @transform_0(%arg0: i32) -> (i32, i32, i32) {
    %c0_i32 = arith.constant 0 : i32
    %c0_i32_0 = arith.constant 0 : i32
    %c0_i32_1 = arith.constant 0 : i32
    return %arg0, %c0_i32, %c0_i32_0 : i32, i32, i32
  }
  func.func @transform_1(%arg0: i32) -> (i32, i32) {
    %c0_i32 = arith.constant 0 : i32
    %c0_i32_0 = arith.constant 0 : i32
    %c0_i32_1 = arith.constant 0 : i32
    return %c0_i32, %c0_i32_0 : i32, i32
  }
  func.func @transform_2(%arg0: i32) -> (i32, i32) {
    %c0_i32 = arith.constant 0 : i32
    %c0_i32_0 = arith.constant 0 : i32
    %c0_i32_1 = arith.constant 0 : i32
    return %c0_i32, %c0_i32_0 : i32, i32
  }
  func.func @transform_3(%arg0: i32) -> (i32, i32) {
    %c0_i32 = arith.constant 0 : i32
    %c0_i32_0 = arith.constant 0 : i32
    %c0_i32_1 = arith.constant 0 : i32
    return %c0_i32, %c0_i32_0 : i32, i32
  }
  func.func @transform_4(%arg0: i32) -> (i32, i32, i32) {
    %c0_i32 = arith.constant 0 : i32
    %c0_i32_0 = arith.constant 0 : i32
    %c0_i32_1 = arith.constant 0 : i32
    return %arg0, %c0_i32, %c0_i32_0 : i32, i32, i32
  }
}

</mosaic_0001>

<bundles_post_ra>
// kernel: famca_forward.2
= control target key start
LH: loop header
LB: loop body
LE: loop exit
PB: predicated region body
PF: predicated region fallthrough
CT: control target
= control target key end

     0   :  { %8 = vsyncpa [#allocation3], 0  ;;  %s661_s0 = inlined_call_operand.vmem [shape: f32[2,8,64], index: 0, kind: input, shape index: {}]   ;;  %s662_s1 = inlined_call_operand.hbm [shape: f32[8,8], index: 1, kind: input, shape index: {}]   ;;  %s663_s2 = inlined_call_operand.hbm [shape: f32[64,256], index: 2, kind: input, shape index: {}]   ;;  %s664_s3 = inlined_call_operand.vmem [shape: f32[2,8,256], index: 3, kind: output, shape index: {}]  }
   0x1   :  { %9 = vsyncpa [#allocation5], 0  ;;  %s595_s12 = smov 0  }
   0x2 LB: > { %s601_s13 = sadd.s32 4294967295, %s567_s12   ;;  %p446_p0 = scmp.ge.s32.totalorder %s567_s12, 1  ;;  %s567_s12 = sphi %s595_s12, %s15_s12  }
   0x3   : > { %p114_p1 = scmp.lt.s32.totalorder %s567_s12, 3  ;;  %p665_p2 = scmp.eq.s32.totalorder %s601_s13, 0 }
   0x4   : > { %s569_s14 = smov [#allocation2]   ;;  %s570_s17 = smov [#allocation4]  }
   0x5   : > { %s127_s15 = sshll.u32 %s569_s14, 4  ;;  %p606_p3 = pnand %p446_p0, %p114_p1  ;;  %s128_s15 = int_to_ptr.vmem [resolvable:$true] %s127_s15 }
   0x6   : > { %s137_s18 = sshll.u32 %s570_s17, 4  ;;  %s512_s20 = scalar_lea.vmem %s128_s15, 128  ;;  %s138_s18 = int_to_ptr.vmem [resolvable:$true] %s137_s18 }
   0x7   : > { %s667_s16 = scalar_select %p606_p3, 1, 0 }
   0x8   : > { %p476_p4 = pneg %p606_p3  ;;  %p513_p7 = scmp.ne.s32.totalorder %s128_s15, %s512_s20 }
   0x9   : > { %p520_p10 = scmp.lt.s32.totalorder %s128_s15, %s128_s15  ;;  %p521_p11 = scmp.lt.s32.totalorder %s512_s20, %s512_s20 }
   0xa   : > { %p614_p5 = pnand %p665_p2, %p476_p4 }
   0xb   : > { %p522_p12 = por %p521_p11, %p520_p10 }
   0xc   : > { %p503_p6 = pneg %p614_p5 }
   0xe   : > { %p515_p8 = pnand %p513_p7, %p503_p6 }
  0x10   : > { %p516_p9 = pneg %p515_p8 }
  0x12   : > { %p523_p13 = pnand %p522_p12, %p516_p9 }
  0x14   : > { %526 = shalt.err (!%p523_p13)
}
  0x15   : > { %479 = dma.hbm_to_vmem [thread:$0]  (!%p614_p5), %s662_s1, 128, %s128_s15, [#allocation3]  }
  0x16   : > { %s538_s23 = scalar_lea.vmem %s138_s18, 2048  ;;  %p546_p7 = scmp.lt.s32.totalorder %s138_s18, %s138_s18 }
  0x17   : > { %p539_p0 = scmp.ne.s32.totalorder %s138_s18, %s538_s23  ;;  %p547_p8 = scmp.lt.s32.totalorder %s538_s23, %s538_s23 }
  0x19   : > { %p541_p1 = pnand %p539_p0, %p503_p6  ;;  %p548_p2 = por %p547_p8, %p546_p7 }
  0x1b   : > { %p542_p4 = pneg %p541_p1 }
  0x1d   : > { %p549_p3 = pnand %p548_p2, %p542_p4 }
  0x1f   : > { %552 = shalt.err (!%p549_p3)
}
  0x20   : > { %s571_s24 = smov 256   ;;  %s572_s25 = smov 16  }
  0x21   : > { %482 = dma.hbm_to_vmem [thread:$0]  (!%p614_p5), %s663_s2, 2048, %s138_s18, [#allocation5], %s571_s24, %s571_s24, %s572_s25  }
  0x22   : > { %p669_p9 = scmp.ne.s32.totalorder %s667_s16, 0 }
  0x23   : > { %p670_p10 = scmp.eq.s32.totalorder (!%p669_p9), %s601_s13, 0 }
  0x24   : > { %160 = sbr.rel (%p669_p9) target bundleno = 444 (0x1bc), region = 32 }
  0x29   : > { %558 = dma.done.wait (%p670_p10), [#allocation3], 128   ;;  %p671_p6 = pmov %p670_p10 }
  0x2b   : > { %560 = vsyncadd (%p671_p6), [#allocation3], 4294967168  ;;  %p672_p2 = pmov %p671_p6 }
  0x2d   : > { %562 = dma.done.wait (%p672_p2), [#allocation5], 2048   ;;  %p673_p3 = pmov %p672_p2 }
  0x2e   : > { %p187_p11 = scmp.lt.s32.totalorder %s601_s13, 1  ;;  %v573_v0 = vmov 0.0   ;;  %vm574_vm0 = vmmov 0   ;;  %vm198_vm1 = vcmask 64512   ;;  %v196_v2 = vld [vmem:[#allocation2] sm:$0xff]  ;;  %v286_v4 = vld [vmem:[#allocation4 + $0x70] sm:$0xff] }
  0x2f   : > { %564 = vsyncadd (%p673_p3), [#allocation5], 4294965248  ;;  %463 = vmatprep.subr.mxu0 %v573_v0  ;;  %465 = vmatprep.mubr.msk.f32.mxu0 %vm574_vm0, %v573_v0  ;;  %v287_v3 = vld [vmem:[#allocation4 + $0x78] sm:$0xff]  ;;  %v285_v5 = vld [vmem:[#allocation4 + $0x68] sm:$0xff]  ;;  %vm288_vm2 = vcmask 523264  }
  0x30   : > { %s675_s13 = smov (!%p187_p11, %s601_s13), 1  ;;  %356 = vmatprep.mubr.f32.mxu1 %v573_v0  ;;  %308 = vmatprep.subr.mxu1 %v287_v3  ;;  %v284_v6 = vld [vmem:[#allocation4 + $0x60] sm:$0xff]  ;;  %v283_v7 = vld [vmem:[#allocation4 + $0x58] sm:$0xff]  ;;  %v282_v8 = vld [vmem:[#allocation4 + $0x50] sm:$0xff] }
  0x31   : > { %s453_s28 = sshll.u32 %s675_s13, 3  ;;  %309 = vmatpush1.msra.mxu1 %v286_v4  ;;  %v281_v9 = vld [vmem:[#allocation4 + $0x48] sm:$0xff]  ;;  %v280_v10 = vld [vmem:[#allocation4 + $0x40] sm:$0xff]  ;;  %v279_v11 = vld [vmem:[#allocation4 + $0x38] sm:$0xff]  ;;  %s460_s5 = sshll.u32 %s675_s13, 4 }
  0x32   : > { %s190_s4 = scalar_lea.vmem %s661_s0, %s453_s28  ;;  %310 = vmatprep.subr.mxu1 %v285_v5  ;;  %v278_v12 = vld [vmem:[#allocation4 + $0x30] sm:$0xff]  ;;  %v277_v13 = vld [vmem:[#allocation4 + $0x28] sm:$0xff]  ;;  %v276_v14 = vld [vmem:[#allocation4 + $0x20] sm:$0xff]  ;;  %s195_s8 = scalar_lea.vmem %s664_s3, %s460_s5 }
  0x33   : > { %v197_v1 = vld [vmem:[%s190_s4] sm:$0xff]  ;;  %311 = vmatpush1.msra.mxu1 %v284_v6  ;;  %v274_v16 = vld [vmem:[#allocation4 + $0x10] sm:$0xff]  ;;  %v273_v17 = vld [vmem:[#allocation4 + $0x8] sm:$0xff] }
  0x34   : > { %464 = vmatpush3.msra.mxu0 %v197_v1  ;;  %312 = vmatprep.subr.mxu1 %v283_v7  ;;  %v275_v15 = vld [vmem:[#allocation4 + $0x18] sm:$0xff]  ;;  %v272_v18 = vld [vmem:[#allocation4] sm:$0xff] }
  0x35   : > { %466 = vmatmul.mubr.msk.f32.vlgmr.msra.gmra.mxu0 %vm198_vm1, %v196_v2  ;;  %313 = vmatpush1.msra.mxu1 %v282_v8 }
  0x36   : > { %314 = vmatprep.subr.mxu1 %v281_v9 }
  0x37   : > { %315 = vmatpush1.msra.mxu1 %v280_v10 }
  0x38   : > { %316 = vmatprep.subr.mxu1 %v279_v11 }
  0x39   : > { %317 = vmatpush1.msra.mxu1 %v278_v12 }
  0x3a   : > { %318 = vmatprep.subr.mxu1 %v277_v13 }
  0x3b   : > { %319 = vmatpush1.msra.mxu1 %v276_v14 }
  0x3c   : > { %320 = vmatprep.subr.mxu1 %v275_v15 }
  0x3d   : > { %321 = vmatpush1.msra.mxu1 %v274_v16 }
  0x3e   : > { %322 = vmatprep.subr.mxu1 %v273_v17 }
  0x3f   : > { %323 = vmatpush1.msra.mxu1 %v272_v18 }
  0xf5   : > { %v268_v19 = vpop.f32.mrf.mxu0 }
  0xf6   : > { %457 = vmatmul.mubr.msk.f32.vlgmr.msra.gmra.mxu1 %vm288_vm2, %v268_v19 }
  0xf7   : > { %v467_v20 = vpop.f32.mrf.mxu0 }
 0x1b6   : > { %v358_v21 = vpop.f32.mrf.mxu1 }
 0x1b7   : > { %v363_v22 = vmax.f32 %v358_v21, 0.0 }
 0x1b8   : > { %v360_v23 = vpop.f32.mrf.mxu1 }
 0x1b9   : > { %365 = vst [vmem:[%s195_s8] sm:$0xff] %v363_v22  ;;  %v364_v24 = vmax.f32 %v360_v23, 0.0 }
 0x1bb   : > { %366 = vst [vmem:[%s195_s8 + $0x8] sm:$0xff] %v364_v24 }
 0x1bc PF: > { %s15_s12 = sadd.s32 1, %s567_s12  }
 0x1bd   : > { %p12_p5 = scmp.ge.s32.totalorder %s15_s12, 4  }
 0x1bf   :  { %14 = sbr.rel (!%p12_p5) target bundleno = 2 (0x2), region = 71 }
 0x1c4   :  { %388 = vsyncpa [#allocation3], 1 }
 0x1c5   :  { %390 = vsyncpa [#allocation3 + $0x1], 1 }
 0x1c6   :  { %391 = vsyncpa [#allocation5], 1 }

// kernel: famca_forward.3
= control target key start
LH: loop header
LB: loop body
LE: loop exit
PB: predicated region body
PF: predicated region fallthrough
CT: control target
= control target key end

     0   :  { %s651_s15 = smov 0   ;;  %s740_s0 = inlined_call_operand.vmem [shape: f32[2,216,256], index: 0, kind: input, shape index: {}]   ;;  %s741_s1 = inlined_call_operand.vmem [shape: f32[8,216], index: 1, kind: input, shape index: {}]   ;;  %s742_s2 = inlined_call_operand.vmem [shape: f32[2,8], index: 2, kind: input, shape index: {}]   ;;  %s743_s3 = inlined_call_operand.vmem [shape: f32[8,2], index: 3, kind: input, shape index: {}]   ;;  %s744_s4 = inlined_call_operand.vmem [shape: f32[2,8,256], index: 4, kind: output, shape index: {}]  }
   0x1 LB: > { %s568_s16 = sadd.s32 4294967295, %s621_s15   ;;  %p572_p0 = scmp.ge.s32.totalorder %s621_s15, 1  ;;  %s621_s15 = sphi %s651_s15, %s14_s15  }
   0x2   : > { %p162_p1 = scmp.lt.s32.totalorder %s621_s15, 3 }
   0x4   : > { %p163_p2 = pnand %p572_p0, %p162_p1 }
   0x5   : > { %p188_p3 = scmp.lt.s32.totalorder (!%p163_p2), %s568_s16, 1 }
   0x6   : > { %166 = sbr.rel (%p163_p2) target bundleno = 964 (0x3c4), region = 36 }
   0xb   : > { %v254_v0 = vld [vmem:[%s741_s1 + $0x8] sm:$0xff]  ;;  %vm285_vm0 = vcmask 719872   ;;  %s746_s16 = smov (!%p188_p3, %s568_s16), 1  ;;  %vm289_vm1 = vcmask 1043456   ;;  %vm624_vm2 = vmmov 0   ;;  %vm344_vm3 = vcmask 64512  }
   0xc   : > { %v256_v1 = vpack.c.bf16 %v254_v0, %v254_v0  ;;  %s598_s19 = smul.u32 432, %s746_s16  ;;  %vm424_vm4 = vcmask 1041408   ;;  %vm420_vm5 = vcmask 15360   ;;  %s583_s29 = sshll.u32 %s746_s16, 4 }
   0xd   : > { %s197_s6 = scalar_lea.vmem %s744_s4, %s583_s29 }
   0xe   : > { %577 = vmatprep.mubr.msk.bf16.mxu0 %vm285_vm0, %v256_v1  ;;  %s668_s22 = scalar_lea.vmem %s740_s0, %s598_s19 }
   0xf   : > { %v228_v2 = vld [vmem:[%s668_s22 + $0xe8] sm:$0xff]  ;;  %v230_v3 = vld [vmem:[%s668_s22 + $0xf8] sm:$0xff]  ;;  %v227_v4 = vld [vmem:[%s668_s22 + $0xe0] sm:$0xff] }
  0x10   : > { %v272_v5 = vpack.c.bf16 %v230_v3, %v228_v2  ;;  %v229_v6 = vld [vmem:[%s668_s22 + $0xf0] sm:$0xff]  ;;  %v224_v7 = vld [vmem:[%s668_s22 + $0xc8] sm:$0xff]  ;;  %v226_v8 = vld [vmem:[%s668_s22 + $0xd8] sm:$0xff] }
  0x11   : > { %v271_v9 = vpack.c.bf16 %v229_v6, %v227_v4  ;;  %v270_v10 = vpack.c.bf16 %v226_v8, %v224_v7  ;;  %v223_v11 = vld [vmem:[%s668_s22 + $0xc0] sm:$0xff]  ;;  %v225_v12 = vld [vmem:[%s668_s22 + $0xd0] sm:$0xff]  ;;  %v220_v13 = vld [vmem:[%s668_s22 + $0xa8] sm:$0xff] }
  0x12   : > { %296 = vmatprep.subr.bf16.mxu0 %v272_v5  ;;  %v222_v14 = vld [vmem:[%s668_s22 + $0xb8] sm:$0xff]  ;;  %v269_v15 = vpack.c.bf16 %v225_v12, %v223_v11  ;;  %v219_v17 = vld [vmem:[%s668_s22 + $0xa0] sm:$0xff]  ;;  %v221_v18 = vld [vmem:[%s668_s22 + $0xb0] sm:$0xff] }
  0x13   : > { %297 = vmatpush1.bf16.msra.mxu0 %v271_v9  ;;  %v268_v16 = vpack.c.bf16 %v222_v14, %v220_v13  ;;  %v216_v19 = vld [vmem:[%s668_s22 + $0x88] sm:$0xff]  ;;  %v218_v20 = vld [vmem:[%s668_s22 + $0x98] sm:$0xff]  ;;  %v267_v21 = vpack.c.bf16 %v221_v18, %v219_v17  ;;  %v215_v23 = vld [vmem:[%s668_s22 + $0x80] sm:$0xff] }
  0x14   : > { %298 = vmatprep.subr.bf16.mxu0 %v270_v10  ;;  %v266_v22 = vpack.c.bf16 %v218_v20, %v216_v19  ;;  %v217_v24 = vld [vmem:[%s668_s22 + $0x90] sm:$0xff]  ;;  %v212_v25 = vld [vmem:[%s668_s22 + $0x68] sm:$0xff]  ;;  %v214_v26 = vld [vmem:[%s668_s22 + $0x78] sm:$0xff] }
  0x15   : > { %v265_v27 = vpack.c.bf16 %v217_v24, %v215_v23  ;;  %v264_v28 = vpack.c.bf16 %v214_v26, %v212_v25  ;;  %v211_v29 = vld [vmem:[%s668_s22 + $0x60] sm:$0xff]  ;;  %v213_v30 = vld [vmem:[%s668_s22 + $0x70] sm:$0xff]  ;;  %v208_v31 = vld [vmem:[%s668_s22 + $0x48] sm:$0xff] }
  0x16   : > { %v210_v32 = vld [vmem:[%s668_s22 + $0x58] sm:$0xff]  ;;  %v263_v33 = vpack.c.bf16 %v213_v30, %v211_v29  ;;  %v207_v35 = vld [vmem:[%s668_s22 + $0x40] sm:$0xff]  ;;  %v209_v36 = vld [vmem:[%s668_s22 + $0x50] sm:$0xff]  ;;  %v623_v30 = vmov 0.0  }
  0x17   : > { %299 = vmatpush1.bf16.msra.mxu0 %v269_v15  ;;  %v262_v34 = vpack.c.bf16 %v210_v32, %v208_v31  ;;  %v204_v37 = vld [vmem:[%s668_s22 + $0x28] sm:$0xff]  ;;  %v206_v38 = vld [vmem:[%s668_s22 + $0x38] sm:$0xff]  ;;  %v261_v39 = vpack.c.bf16 %v209_v36, %v207_v35  ;;  %v203_v41 = vld [vmem:[%s668_s22 + $0x20] sm:$0xff]  ;;  %588 = vmatprep.subr.mxu1 %v623_v30 }
  0x18   : > { %300 = vmatprep.subr.bf16.mxu0 %v268_v16  ;;  %v260_v40 = vpack.c.bf16 %v206_v38, %v204_v37  ;;  %v205_v42 = vld [vmem:[%s668_s22 + $0x30] sm:$0xff]  ;;  %v200_v43 = vld [vmem:[%s668_s22 + $0x8] sm:$0xff]  ;;  %v202_v44 = vld [vmem:[%s668_s22 + $0x18] sm:$0xff]  ;;  %590 = vmatprep.mubr.msk.f32.mxu1 %vm624_vm2, %v623_v30  ;;  %v625_v38 = vmov 0  }
  0x19   : > { %v259_v45 = vpack.c.bf16 %v205_v42, %v203_v41  ;;  %v258_v46 = vpack.c.bf16 %v202_v44, %v200_v43  ;;  %v199_v47 = vld [vmem:[%s668_s22] sm:$0xff]  ;;  %v201_v48 = vld [vmem:[%s668_s22 + $0x10] sm:$0xff]  ;;  %v252_v49 = vld [vmem:[%s668_s22 + $0x1a8] sm:$0xff]  ;;  %610 = vset.pattern.permute.xlu0 %v625_v38 }
  0x1a   : > { %v251_v50 = vld [vmem:[%s668_s22 + $0x1a0] sm:$0xff]  ;;  %v257_v51 = vpack.c.bf16 %v201_v48, %v199_v47  ;;  %v284_v52 = vpack.c.bf16 %v252_v49, %v252_v49  ;;  %v248_v54 = vld [vmem:[%s668_s22 + $0x188] sm:$0xff]  ;;  %v250_v55 = vld [vmem:[%s668_s22 + $0x198] sm:$0xff] }
  0x1b   : > { %301 = vmatpush1.bf16.msra.mxu0 %v267_v21  ;;  %v283_v53 = vpack.c.bf16 %v251_v50, %v251_v50  ;;  %v282_v57 = vpack.c.bf16 %v250_v55, %v248_v54  ;;  %v247_v58 = vld [vmem:[%s668_s22 + $0x180] sm:$0xff]  ;;  %v249_v59 = vld [vmem:[%s668_s22 + $0x190] sm:$0xff]  ;;  %v244_v60 = vld [vmem:[%s668_s22 + $0x168] sm:$0xff] }
  0x1c   : > { %302 = vmatprep.subr.bf16.mxu0 %v266_v22  ;;  %v246_v61 = vld [vmem:[%s668_s22 + $0x178] sm:$0xff]  ;;  %v281_v62 = vpack.c.bf16 %v249_v59, %v247_v58  ;;  %v243_v0 = vld [vmem:[%s668_s22 + $0x160] sm:$0xff]  ;;  %v245_v1 = vld [vmem:[%s668_s22 + $0x170] sm:$0xff] }
  0x1d   : > { %v291_v56 = vsel %vm289_vm1, %v283_v53, 0  ;;  %v280_v63 = vpack.c.bf16 %v246_v61, %v244_v60  ;;  %v240_v2 = vld [vmem:[%s668_s22 + $0x148] sm:$0xff]  ;;  %v242_v3 = vld [vmem:[%s668_s22 + $0x158] sm:$0xff]  ;;  %v279_v4 = vpack.c.bf16 %v245_v1, %v243_v0  ;;  %v239_v6 = vld [vmem:[%s668_s22 + $0x140] sm:$0xff] }
  0x1e   : > { %v278_v5 = vpack.c.bf16 %v242_v3, %v240_v2  ;;  %v241_v7 = vld [vmem:[%s668_s22 + $0x150] sm:$0xff]  ;;  %v236_v8 = vld [vmem:[%s668_s22 + $0x128] sm:$0xff]  ;;  %v238_v9 = vld [vmem:[%s668_s22 + $0x138] sm:$0xff] }
  0x1f   : > { %303 = vmatpush1.bf16.msra.mxu0 %v265_v27  ;;  %v277_v10 = vpack.c.bf16 %v241_v7, %v239_v6  ;;  %v276_v11 = vpack.c.bf16 %v238_v9, %v236_v8  ;;  %v235_v12 = vld [vmem:[%s668_s22 + $0x120] sm:$0xff]  ;;  %v237_v13 = vld [vmem:[%s668_s22 + $0x130] sm:$0xff]  ;;  %v232_v14 = vld [vmem:[%s668_s22 + $0x108] sm:$0xff] }
  0x20   : > { %304 = vmatprep.subr.bf16.mxu0 %v264_v28  ;;  %v234_v15 = vld [vmem:[%s668_s22 + $0x118] sm:$0xff]  ;;  %v275_v16 = vpack.c.bf16 %v237_v13, %v235_v12  ;;  %v231_v18 = vld [vmem:[%s668_s22 + $0x100] sm:$0xff]  ;;  %v233_v19 = vld [vmem:[%s668_s22 + $0x110] sm:$0xff] }
  0x21   : > { %v274_v17 = vpack.c.bf16 %v234_v15, %v232_v14  ;;  %v273_v20 = vpack.c.bf16 %v233_v19, %v231_v18  ;;  %v253_v21 = vld [vmem:[%s741_s1] sm:$0xff] }
  0x22   : > { %v255_v22 = vpack.c.bf16 %v253_v21, %v253_v21  ;;  %v419_v36 = vld [vmem:[%s743_s3] sm:$0xff] }
  0x23   : > { %305 = vmatpush1.bf16.msra.mxu0 %v263_v33  ;;  %v343_v33 = vld [vmem:[%s742_s2] sm:$0x3] }
  0x24   : > { %306 = vmatprep.subr.bf16.mxu0 %v262_v34 }
  0x27   : > { %307 = vmatpush1.bf16.msra.mxu0 %v261_v39 }
  0x28   : > { %308 = vmatprep.subr.bf16.mxu0 %v260_v40 }
  0x2b   : > { %309 = vmatpush1.bf16.msra.mxu0 %v259_v45 }
  0x2c   : > { %310 = vmatprep.subr.bf16.mxu0 %v258_v46 }
  0x2f   : > { %311 = vmatpush1.bf16.msra.mxu0 %v257_v51 }
  0x30   : > { %576 = vmatprep.subr.msk.bf16.mxu0 %vm289_vm1, %v284_v52 }
  0x33   : > { %317 = vmatpush2.bf16.msra.mxu0 %v291_v56 }
  0x34   : > { %318 = vmatprep.subr.bf16.mxu0 %v282_v57 }
  0x37   : > { %319 = vmatpush2.bf16.msra.mxu0 %v281_v62 }
  0x38   : > { %320 = vmatprep.subr.bf16.mxu0 %v280_v63 }
  0x3b   : > { %321 = vmatpush2.bf16.msra.mxu0 %v279_v4 }
  0x3c   : > { %322 = vmatprep.subr.bf16.mxu0 %v278_v5 }
  0x3f   : > { %323 = vmatpush2.bf16.msra.mxu0 %v277_v10 }
  0x40   : > { %324 = vmatprep.subr.bf16.mxu0 %v276_v11 }
  0x43   : > { %325 = vmatpush2.bf16.msra.mxu0 %v275_v16 }
  0x44   : > { %326 = vmatprep.subr.bf16.mxu0 %v274_v17 }
  0x47   : > { %327 = vmatpush2.bf16.msra.mxu0 %v273_v20 }
  0x4a   : > { %329 = vmatmul.mubr.bf16.vlgmr.msra.gmra.mxu0 %v255_v22 }
 0x10a   : > { %v330_v23 = vpop.f32.mrf.mxu0 }
 0x10b   : > { %v337_v25 = vmax.f32 %v330_v23, 0.0 }
 0x10c   : > { %v332_v24 = vpop.f32.mrf.mxu0 }
 0x10d   : > { %v338_v26 = vmax.f32 %v332_v24, 0.0 }
 0x10e   : > { %v334_v27 = vpop.f32.mrf.mxu0 }
 0x10f   : > { %v339_v28 = vadd.f32 %v338_v26, %v337_v25 }
 0x110   : > { %v335_v29 = vpop.f32.mrf.mxu0 }
 0x111   : > { %340 = vadd.xlane.f32.xlu0 %v339_v28 }
 0x19a   : > { %v341_v31 = vpop.xlane.xlu0 %340 }
 0x19b   : > { %v342_v32 = vmul.f32 0.00390625, %v341_v31 }
 0x19d   : > { %589 = vmatpush3.msra.mxu1 %v342_v32 }
 0x19e   : > { %591 = vmatmul.mubr.msk.f32.vlgmr.msra.gmra.mxu1 %vm344_vm3, %v343_v33  ;;  %593 = vmatprep.subr.mxu1 %v623_v30 }
 0x19f   : > { %595 = vmatprep.mubr.msk.f32.mxu1 %vm624_vm2, %v623_v30 }
 0x25e   : > { %v414_v34 = vpop.f32.mrf.mxu1 }
 0x25f   : > { %v418_v35 = vmax.f32 %v414_v34, 0.0 }
 0x260   : > { %v592_v37 = vpop.f32.mrf.mxu1 }
 0x261   : > { %594 = vmatpush3.msk.msra.mxu1 %vm424_vm4, %v418_v35 }
 0x262   : > { %596 = vmatmul.mubr.msk.f32.vlgmr.msra.gmra.mxu1 %vm420_vm5, %v419_v36 }
 0x322   : > { %v494_v39 = vpop.f32.mrf.mxu1 }
 0x323   : > { %v498_v40 = vsub.f32 0.0, %v494_v39 }
 0x324   : > { %v597_v41 = vpop.f32.mrf.mxu1 }
 0x325   : > { %v499_v42 = vmul.f32 1.442695, %v498_v40 }
 0x327   : > { %611 = vpow2.f32 %v499_v42 }
 0x334   : > { %v612_v43 = vpop.eup %611 }
 0x335   : > { %v501_v44 = vadd.f32 1.0, %v612_v43 }
 0x337   : > { %613 = vrcp.f32 %v501_v44 }
 0x344   : > { %v614_v45 = vpop.eup %613 }
 0x345   : > { %506 = vperm.xlu0 %610, %v614_v45  }
 0x3c0   : > { %v507_v46 = vpop.permute.xlu0 %506 }
 0x3c1   : > { %v509_v47 = vmul.f32 %v507_v46, %v337_v25  ;;  %v510_v48 = vmul.f32 %v507_v46, %v338_v26 }
 0x3c3   : > { %511 = vst [vmem:[%s197_s6] sm:$0xff] %v509_v47  ;;  %512 = vst [vmem:[%s197_s6 + $0x8] sm:$0xff] %v510_v48 }
 0x3c4 PF: > { %s14_s15 = sadd.s32 1, %s621_s15  }
 0x3c5   : > { %p11_p4 = scmp.ge.s32.totalorder %s14_s15, 4  }
 0x3c7   :  { %13 = sbr.rel (!%p11_p4) target bundleno = 1 (0x1), region = 66 }

</bundles_post_ra>
